<compile_context>
chip_gen: v5e
topology: v5e:2x2
jax: 0.10.0
libtpu: 0.0.40
codegen_flags: <defaults>
</compile_context>

<pallas_src>
import jax
import jax.numpy as jnp
from jax import lax
from jax.experimental import pallas as pl
from jax.experimental.pallas import tpu as pltpu


def gatu2d_kernel(x_ref, w_ref, b_ref, o_ref):
    """x_ref/o_ref: (Nb, C, TS) | w_ref: (2, C, C) | b_ref: (2, C, 1).

    Channels sit on sublanes, spatial on lanes.  Weights are sliced on the
    major axis (layout-free even when C % 8 != 0); the tanh*sigmoid gate is
    applied in-register and stored lane-dense.
    """
    w1 = w_ref[0]                       # (C, C)  conv1 weight
    w2 = w_ref[1]                       # (C, C)  conv2 weight
    b1 = b_ref[0]                       # (C, 1)
    b2 = b_ref[1]                       # (C, 1)
    nb = x_ref.shape[0]

    def one_row(bi, carry):
        x = x_ref[bi]                   # (C, TS)
        h1 = jnp.dot(w1, x, preferred_element_type=jnp.float32) + b1
        h2 = jnp.dot(w2, x, preferred_element_type=jnp.float32) + b2
        # sigmoid(z) == 0.5*(tanh(z/2)+1): one EUP tanh instead of exp+divide.
        gate = 0.5 * (jnp.tanh(0.5 * h2) + 1.0)
        o_ref[bi] = (jnp.tanh(h1) * gate).astype(o_ref.dtype)
        return carry

    if nb == 1:
        one_row(0, 0)
    else:
        # fori_loop (not a Python for) bounds live f32 temps to one batch row.
        lax.fori_loop(0, nb, one_row, 0, unroll=(nb <= 4))


def _round_up(v, m):
    return ((v + m - 1) // m) * m


def _vmem_budgets():
    """Generation-aware (pipeline budget, scoped vmem_limit_bytes)."""
    try:
        cap = int(getattr(pltpu.get_tpu_info(), "vmem_capacity_bytes", 0))
    except Exception:
        cap = 0
    if cap <= 0:
        cap = 64 * 1024 * 1024          # v7x-safe fallback
    limit = min(int(cap * 0.85), 100 * 1024 * 1024)   # v7x ~54 MiB, v5e/v6e 100 MiB
    budget = min(cap // 2, 48 * 1024 * 1024)          # v7x 32 MiB, v5e/v6e 48 MiB
    return budget, limit


def _choose_tiling(N, C, S, budget):
    """Pick (Nb, ts): batch block (divides N) and multiple-of-128 spatial tile.

    Accounting uses sublane-padded channels, double-buffered x/out tiles,
    resident (double-buffered) stacked weights, and 2x headroom on the f32
    epilogue temps that Mosaic materializes per batch row.
    """
    c_pad = _round_up(C, 8)
    const = 2 * (2 * c_pad * c_pad + 2 * c_pad) * 4       # weights + bias, dbl-buf
    avail = max(budget - const, 2 * 1024 * 1024)

    io_row = 4 * c_pad * 4              # dbl-buffered x + out, per (batch-row, lane)
    tmp_row = 2 * 6 * c_pad * 4         # ~6 f32 temp slabs (one row live), 2x headroom

    def step_bytes(nb, lanes):
        return nb * lanes * io_row + lanes * tmp_row

    # --- spatial tile (multiple of 128 lanes, never overruns S) -------------
    if S <= 128:
        ts = S                           # full-extent last dim is allowed
        lanes = _round_up(S, 128)
        s_steps = 1
    else:
        s_cap = (S // 128) * 128
        max_lanes = (avail // step_bytes(1, 1) // 128) * 128
        ts = max(128, min(s_cap, max_lanes))
        # N==1: keep >= 2 spatial steps so megacore / dual-TC parts don't idle.
        if N == 1 and pl.cdiv(S, ts) < 2 and s_cap >= 256:
            ts = max(128, _round_up(pl.cdiv(S, 2), 128))
        lanes = ts
        s_steps = pl.cdiv(S, ts)

    # --- batch block: amortize the ~0.35us per-step overhead -----------------
    nb = 1
    if N > 1:
        max_nb = N if s_steps >= 2 else N // 2   # keep >= 2 total grid steps
        max_nb = min(max_nb, 256)
        for cand in range(max_nb, 1, -1):
            if N % cand == 0 and step_bytes(cand, lanes) <= avail:
                nb = cand
                break
    return nb, ts


@jax.jit
def gatu2d_pallas(x_nchw, w1, b1, w2, b2):
    """GATU2D forward: tanh(conv1(x)) * sigmoid(conv2(x)) with 1x1 convs.

    x_nchw: (N, C, H, W); w1/w2: squeezed torch conv weights (C, C); b1/b2: (C,).
    """
    N, C, H, W = x_nchw.shape
    S = H * W
    x = x_nchw.reshape(N, C, S)                       # free: NCHW is contiguous
    w = jnp.stack([w1, w2], axis=0)                   # (2, C, C)
    b = jnp.stack([b1, b2], axis=0).reshape(2, C, 1)  # (2, C, 1)

    budget, vmem_limit = _vmem_budgets()
    nb, ts = _choose_tiling(N, C, S, budget)
    grid = (N // nb, pl.cdiv(S, ts))                  # tail spatial block is masked

    out = pl.pallas_call(
        gatu2d_kernel,
        out_shape=jax.ShapeDtypeStruct((N, C, S), x.dtype),
        grid_spec=pltpu.PrefetchScalarGridSpec(
            num_scalar_prefetch=0,
            grid=grid,
            in_specs=[
                pl.BlockSpec((nb, C, ts), lambda n, s: (n, 0, s)),   # x tile
                pl.BlockSpec((2, C, C), lambda n, s: (0, 0, 0)),     # stacked W
                pl.BlockSpec((2, C, 1), lambda n, s: (0, 0, 0)),     # stacked b
            ],
            out_specs=pl.BlockSpec((nb, C, ts), lambda n, s: (n, 0, s)),
        ),
        compiler_params=pltpu.CompilerParams(
            # Disjoint output blocks on both axes -> megacore / dual-TC shard.
            dimension_semantics=("parallel", "parallel"),
            vmem_limit_bytes=vmem_limit,
        ),
    )(x, w, b)

    return out.reshape(N, C, H, W)


def gatu2d_reference(x_nchw, w1, b1, w2, b2):
    # Plain-JAX reference of the PyTorch forward (NCHW) for verification.
    h1 = jnp.einsum("oc,nchw->nohw", w1, x_nchw) + b1[None, :, None, None]
    h2 = jnp.einsum("oc,nchw->nohw", w2, x_nchw) + b2[None, :, None, None]
    return jnp.tanh(h1) * jax.nn.sigmoid(h2)


def _make_params(key, c):
    kw1, kb1, kw2, kb2 = jax.random.split(key, 4)
    # nn.init.normal_(.., 0.0, 0.05) on weights and biases of both 1x1 convs;
    # conv weight (C, C, 1, 1) stored squeezed as (C, C).
    w1 = 0.05 * jax.random.normal(kw1, (c, c), dtype=jnp.float32)
    b1 = 0.05 * jax.random.normal(kb1, (c,), dtype=jnp.float32)
    w2 = 0.05 * jax.random.normal(kw2, (c, c), dtype=jnp.float32)
    b2 = 0.05 * jax.random.normal(kb2, (c,), dtype=jnp.float32)
    return w1, b1, w2, b2


def _check(key, shape, tag):
    n, c, h, w = shape
    kx, kp = jax.random.split(key)
    x = jax.random.normal(kx, shape, dtype=jnp.float32)
    w1, b1, w2, b2 = _make_params(kp, c)
    out = jax.block_until_ready(gatu2d_pallas(x, w1, b1, w2, b2))
    ref = gatu2d_reference(x, w1, b1, w2, b2)
    assert out.shape == shape, f"shape mismatch ({tag})"
    assert jnp.allclose(out, ref, atol=1e-5, rtol=1e-5), f"mismatch vs reference ({tag})"


if __name__ == "__main__":
    key = jax.random.PRNGKey(0)
    k1, k2, k3, k4 = jax.random.split(key, 4)

    # Primary demo shape (small, consistent with the module).
    _check(k1, (2, 4, 16, 16), "baseline")
    # Ragged spatial size: masked tail block, batch-blocked fori_loop path.
    _check(k2, (2, 8, 11, 13), "ragged spatial")
    # Larger batch: exercises batch blocking (Nb>4, rolled fori_loop).
    _check(k3, (16, 4, 16, 16), "batch blocking")
    # Single image: exercises the >=2 spatial tiles rule for dual-TC parts.
    _check(k4, (1, 4, 32, 32), "single batch split")

    print("KERNEL_OK")
</pallas_src>

<mosaic_0001>
module attributes {stable_mosaic.version = 11 : i64} {
  func.func @gatu2d_kernel(%arg0: i32, %arg1: i32, %arg2: memref<1x4x256xf32, #tpu.memory_space<vmem>>, %arg3: memref<2x4x4xf32, #tpu.memory_space<vmem>>, %arg4: memref<2x4x1xf32, #tpu.memory_space<vmem>>, %arg5: memref<1x4x256xf32, #tpu.memory_space<vmem>>) attributes {dimension_semantics = [#tpu.dimension_semantics<parallel>, #tpu.dimension_semantics<parallel>], iteration_bounds = array<i64: 2, 1>, scalar_prefetch = 0 : i64, scratch_operands = 0 : i64, tpu.core_type = #tpu.core_type<tc>, window_params = [{transform_indices = @transform_0, window_bounds = array<i64: 1, 4, 256>}, {pipeline_mode = #tpu.pipeline_mode<synchronous>, transform_indices = @transform_1, window_bounds = array<i64: 2, 4, 4>}, {pipeline_mode = #tpu.pipeline_mode<synchronous>, transform_indices = @transform_2, window_bounds = array<i64: 2, 4, 1>}, {transform_indices = @transform_3, window_bounds = array<i64: 1, 4, 256>}]} {
    %c0 = arith.constant 0 : index
    %c0_0 = arith.constant 0 : index
    %c0_1 = arith.constant 0 : index
    %0 = vector.load %arg3[%c0, %c0_0, %c0_1] : memref<2x4x4xf32, #tpu.memory_space<vmem>>, vector<1x4x4xf32>
    %1 = vector.shape_cast %0 : vector<1x4x4xf32> to vector<4x4xf32>
    %c1 = arith.constant 1 : index
    %c0_2 = arith.constant 0 : index
    %c0_3 = arith.constant 0 : index
    %2 = vector.load %arg3[%c1, %c0_2, %c0_3] : memref<2x4x4xf32, #tpu.memory_space<vmem>>, vector<1x4x4xf32>
    %3 = vector.shape_cast %2 : vector<1x4x4xf32> to vector<4x4xf32>
    %c0_4 = arith.constant 0 : index
    %c0_5 = arith.constant 0 : index
    %c0_6 = arith.constant 0 : index
    %4 = vector.load %arg4[%c0_4, %c0_5, %c0_6] : memref<2x4x1xf32, #tpu.memory_space<vmem>>, vector<1x4x1xf32>
    %5 = vector.shape_cast %4 : vector<1x4x1xf32> to vector<4x1xf32>
    %c1_7 = arith.constant 1 : index
    %c0_8 = arith.constant 0 : index
    %c0_9 = arith.constant 0 : index
    %6 = vector.load %arg4[%c1_7, %c0_8, %c0_9] : memref<2x4x1xf32, #tpu.memory_space<vmem>>, vector<1x4x1xf32>
    %7 = vector.shape_cast %6 : vector<1x4x1xf32> to vector<4x1xf32>
    %c0_10 = arith.constant 0 : index
    %c0_11 = arith.constant 0 : index
    %c0_12 = arith.constant 0 : index
    %8 = vector.load %arg2[%c0_10, %c0_11, %c0_12] : memref<1x4x256xf32, #tpu.memory_space<vmem>>, vector<1x4x256xf32>
    %9 = vector.shape_cast %8 : vector<1x4x256xf32> to vector<4x256xf32>
    %cst = arith.constant dense<0.000000e+00> : vector<4x256xf32>
    %10 = tpu.matmul %1, %9, %cst {dimension_numbers = #tpu.dot_dimension_numbers<[1], [0], [0], [1], [0, 0, 1, 1], [], []>} : vector<4x4xf32>, vector<4x256xf32>, vector<4x256xf32> -> vector<4x256xf32>
    %11 = vector.broadcast %5 : vector<4x1xf32> to vector<4x256xf32>
    %12 = arith.addf %10, %11 : vector<4x256xf32>
    %cst_13 = arith.constant dense<0.000000e+00> : vector<4x256xf32>
    %13 = tpu.matmul %3, %9, %cst_13 {dimension_numbers = #tpu.dot_dimension_numbers<[1], [0], [0], [1], [0, 0, 1, 1], [], []>} : vector<4x4xf32>, vector<4x256xf32>, vector<4x256xf32> -> vector<4x256xf32>
    %14 = vector.broadcast %7 : vector<4x1xf32> to vector<4x256xf32>
    %15 = arith.addf %13, %14 : vector<4x256xf32>
    %cst_14 = arith.constant 5.000000e-01 : f32
    %16 = vector.broadcast %cst_14 : f32 to vector<4x256xf32>
    %17 = arith.mulf %16, %15 : vector<4x256xf32>
    %18 = math.tanh %17 : vector<4x256xf32>
    %cst_15 = arith.constant 1.000000e+00 : f32
    %19 = vector.broadcast %cst_15 : f32 to vector<4x256xf32>
    %20 = arith.addf %18, %19 : vector<4x256xf32>
    %cst_16 = arith.constant 5.000000e-01 : f32
    %21 = vector.broadcast %cst_16 : f32 to vector<4x256xf32>
    %22 = arith.mulf %21, %20 : vector<4x256xf32>
    %23 = math.tanh %12 : vector<4x256xf32>
    %24 = arith.mulf %23, %22 : vector<4x256xf32>
    %c0_17 = arith.constant 0 : index
    %c0_18 = arith.constant 0 : index
    %c0_19 = arith.constant 0 : index
    %25 = vector.load %arg5[%c0_17, %c0_18, %c0_19] : memref<1x4x256xf32, #tpu.memory_space<vmem>>, vector<1x4x256xf32>
    %26 = vector.shape_cast %25 : vector<1x4x256xf32> to vector<4x256xf32>
    %27 = vector.shape_cast %24 : vector<4x256xf32> to vector<1x4x256xf32>
    tpu.vector_store %arg5[%c0_17, %c0_18, %c0_19], %27 {strides = array<i32>} : memref<1x4x256xf32, #tpu.memory_space<vmem>>, vector<1x4x256xf32>,
    return
  }
  func.func @transform_0(%arg0: i32, %arg1: i32) -> (i32, i32, i32) {
    %c0_i32 = arith.constant 0 : i32
    %c0_i32_0 = arith.constant 0 : i32
    return %arg0, %c0_i32, %arg1 : i32, i32, i32
  }
  func.func @transform_1(%arg0: i32, %arg1: i32) -> (i32, i32, i32) {
    %c0_i32 = arith.constant 0 : i32
    %c0_i32_0 = arith.constant 0 : i32
    %c0_i32_1 = arith.constant 0 : i32
    %c0_i32_2 = arith.constant 0 : i32
    return %c0_i32, %c0_i32_0, %c0_i32_1 : i32, i32, i32
  }
  func.func @transform_2(%arg0: i32, %arg1: i32) -> (i32, i32, i32) {
    %c0_i32 = arith.constant 0 : i32
    %c0_i32_0 = arith.constant 0 : i32
    %c0_i32_1 = arith.constant 0 : i32
    %c0_i32_2 = arith.constant 0 : i32
    return %c0_i32, %c0_i32_0, %c0_i32_1 : i32, i32, i32
  }
  func.func @transform_3(%arg0: i32, %arg1: i32) -> (i32, i32, i32) {
    %c0_i32 = arith.constant 0 : i32
    %c0_i32_0 = arith.constant 0 : i32
    return %arg0, %c0_i32, %arg1 : i32, i32, i32
  }
}

</mosaic_0001>

<bundles_post_ra>
// kernel: gatu2d_pallas.1
= control target key start
LH: loop header
LB: loop body
LE: loop exit
PB: predicated region body
PF: predicated region fallthrough
CT: control target
= control target key end

     0   :  { %s537_s12 = smov 0   ;;  %s539_s13 = smov 0   ;;  %s594_s0 = inlined_call_operand.vmem [shape: f32[2,4,256], index: 0, kind: input, shape index: {}]   ;;  %s595_s1 = inlined_call_operand.vmem [shape: f32[2,4,4], index: 1, kind: input, shape index: {}]   ;;  %s596_s2 = inlined_call_operand.vmem [shape: f32[2,4,1], index: 2, kind: input, shape index: {}]   ;;  %s597_s3 = inlined_call_operand.vmem [shape: f32[2,4,256], index: 3, kind: output, shape index: {}]  }
   0x1   :  { %s541_s14 = smov 0  }
   0x2 LB: > { %s25_s15 = sadd.s32 1, %s510_s13  ;;  %p439_p0 = scmp.ge.s32.totalorder %s514_s14, 1  ;;  %s514_s14 = sphi %s541_s14, %s13_s14   ;;  %s510_s13 = sphi %s539_s13, %s599_s13   ;;  %s506_s12 = sphi %s537_s12, %s598_s12  }
   0x3   : > { %p27_p1 = scmp.ge.s32.totalorder %s25_s15, 2  ;;  %p158_p2 = scmp.lt.s32.totalorder %s514_s14, 3 }
   0x5   : > { %s601_s15 = smov (%p27_p1, %s25_s15), 0  ;;  %p159_p3 = pnand %p439_p0, %p158_p2 }
   0x6   : > { %p191_p4 = scmp.lt.s32.totalorder (!%p159_p3), %s506_s12, 1 }
   0x7   : > { %162 = sbr.rel (%p159_p3) target bundleno = 187 (0xbb), region = 32 }
   0xc   : > { %v516_v0 = vmov 0   ;;  %v445_v1 = vld [vmem:[%s596_s2 + $0x4] sm:$0xf]  ;;  %s603_s12 = smov (!%p191_p4, %s506_s12), 1  ;;  %v213_v3 = vld [vmem:[%s596_s2] sm:$0xf] }
   0xd   : > { %483 = vset.pattern.permute.xlu0 %v516_v0  ;;  %s456_s18 = sshll.u32 %s603_s12, 3  ;;  %vm230_vm0 = vcmask 1043456   ;;  %v210_v4 = vld [vmem:[%s595_s1] sm:$0xf]  ;;  %vm226_vm1 = vcmask 31744  }
   0xe   : > { %277 = vperm.xlu0 %483, %v445_v1   ;;  %s198_s21 = scalar_lea.vmem %s594_s0, %s456_s18  ;;  %v444_v7 = vld [vmem:[%s595_s1 + $0x4] sm:$0xf]  ;;  %s208_s30 = scalar_lea.vmem %s597_s3, %s456_s18 }
   0xf   : > { %v216_v2 = vld [vmem:[%s198_s21] sm:$0xff] }
  0x10   : > { %223 = vst [vmem:[#allocation1] ss:$2 sm:$0xff] %v216_v2 }
  0x16   : > { %219 = vperm.xlu0 %483, %v213_v3  }
  0x17   : > { %v224_v5 = vld.sshfl [vmem:[#allocation1] sm:$0xff pattern:$0x75316420]  ;;  %v225_v6 = vld.sshfl [vmem:[#allocation1 + $0x8] sm:$0xff pattern:$0x75316420] }
  0x18   : > { %280 = vst [vmem:[#allocation1] ss:$2 sm:$0xff] %v216_v2  ;;  %446 = vmatpush.msk.msra.mxu0 %vm230_vm0, %v224_v5  ;;  %448 = vmatpush.msk.msra.mxu1 %vm230_vm0, %v225_v6 }
  0x19   : > { %447 = vmatmul.msk.f32.vlgmr.msra.gmra.mxu0 %vm226_vm1, %v210_v4  ;;  %449 = vmatmul.msk.f32.vlgmr.msra.gmra.mxu1 %vm226_vm1, %v210_v4 }
  0x1f   : > { %v281_v8 = vld.sshfl [vmem:[#allocation1] sm:$0xff pattern:$0x75316420]  ;;  %v282_v9 = vld.sshfl [vmem:[#allocation1 + $0x8] sm:$0xff pattern:$0x75316420] }
  0x20   : > { %450 = vmatpush.msk.msra.mxu2 %vm230_vm0, %v281_v8  ;;  %452 = vmatpush.msk.msra.mxu3 %vm230_vm0, %v282_v9 }
  0x21   : > { %451 = vmatmul.msk.f32.vlgmr.msra.gmra.mxu2 %vm226_vm1, %v444_v7  ;;  %453 = vmatmul.msk.f32.vlgmr.msra.gmra.mxu3 %vm226_vm1, %v444_v7 }
  0x80   : > { %v278_v10 = vpop.permute.xlu0 %277 }
  0x88   : > { %v220_v15 = vpop.permute.xlu0 %219 }
  0x96   : > { %v272_v16 = vpop.f32.mrf.mxu1  ;;  %v252_v19 = vpop.f32.mrf.mxu0 }
  0x97   : > { %v273_v20 = vadd.f32 %v272_v16, %v220_v15  ;;  %v253_v21 = vadd.f32 %v252_v19, %v220_v15 }
  0xa4   : > { %v307_v11 = vpop.f32.mrf.mxu2  ;;  %v327_v12 = vpop.f32.mrf.mxu3 }
  0xa5   : > { %v308_v13 = vadd.f32 %v307_v11, %v278_v10  ;;  %v328_v14 = vadd.f32 %v327_v12, %v278_v10 }
  0xa7   : > { %v330_v17 = vmul.f32 0.5, %v308_v13  ;;  %v331_v18 = vmul.f32 0.5, %v328_v14 }
  0xa9   : > { %484 = vtanh.f32 %v330_v17 }
  0xaa   : > { %486 = vtanh.f32 %v331_v18 }
  0xab   : > { %488 = vtanh.f32 %v273_v20 }
  0xac   : > { %490 = vtanh.f32 %v253_v21 }
  0xaf   : > { %v485_v22 = vpop.eup %484 }
  0xb0   : > { %v487_v23 = vpop.eup %486  ;;  %v334_v24 = vadd.f32 1.0, %v485_v22 }
  0xb1   : > { %v335_v25 = vadd.f32 1.0, %v487_v23  ;;  %v489_v28 = vpop.eup %488 }
  0xb2   : > { %v336_v26 = vmul.f32 0.5, %v334_v24  ;;  %v491_v30 = vpop.eup %490 }
  0xb3   : > { %v337_v27 = vmul.f32 0.5, %v335_v25 }
  0xb4   : > { %v340_v31 = vmul.f32 %v491_v30, %v336_v26 }
  0xb5   : > { %v341_v29 = vmul.f32 %v489_v28, %v337_v27 }
  0xb7   : > { %v344_v32 = vrot.slane %v341_v29, 4 }
  0xb9   : > { %v345_v33 = vsel %vm230_vm0, %v340_v31, %v344_v32 }
  0xba   : > { %347 = vst [vmem:[%s208_s30] sm:$0xff] %v345_v33 }
  0xbb PF: > { %s13_s14 = sadd.s32 1, %s514_s14   ;;  %s598_s12 = smov %s510_s13 }
  0xbc   : > { %p10_p5 = scmp.ge.s32.totalorder %s13_s14, 4   ;;  %s599_s13 = smov %s601_s15 }
  0xbe   :  { %12 = sbr.rel (!%p10_p5) target bundleno = 2 (0x2), region = 64 }

</bundles_post_ra>
